<compile_context>
chip_gen: v7x
topology: tpu7x:2x2x1
jax: 0.10.0
libtpu: 0.0.40
codegen_flags: <defaults>
</compile_context>

<pallas_src>
import jax
import jax.numpy as jnp
from jax.experimental import pallas as pl
from jax.experimental.pallas import tpu as pltpu


def _mlp_kernel(*refs):
    """refs = (x_ref, W1, b1, W2, b2, ..., w_out, b_out, o_ref).

    x_ref : [D0, tb]      features on sublanes, batch on lanes
    W_i   : [out, in]     b_i : [out, 1]
    w_out : [hidden, 1]   b_out : [1, 1]
    o_ref : [1, tb]
    """
    x_ref = refs[0]
    o_ref = refs[-1]
    param_refs = refs[1:-1]
    n_hidden = (len(param_refs) - 2) // 2  # number of Linear+ReLU blocks

    h = x_ref[...]  # (D0, tb) f32
    for i in range(n_hidden):
        w = param_refs[2 * i][...]          # (out, in)
        b = param_refs[2 * i + 1][...]      # (out, 1) -> broadcast over lanes
        h = jnp.dot(w, h, preferred_element_type=jnp.float32) + b
        h = jnp.maximum(h, 0.0)             # ReLU
        # TODO(synk): nn.Dropout is identity at inference time; training-mode
        # dropout (pltpu.prng_random_bits mask) is intentionally omitted.

    # Final Linear(out_features=1): VPU multiply + sublane reduce (XLU) instead
    # of a degenerate 1-wide MXU matmul. Result is already lane-dense (1, tb).
    w_out = param_refs[-2][...]             # (hidden, 1)
    b_out = param_refs[-1][...]             # (1, 1)
    z = jnp.sum(h * w_out, axis=0, keepdims=True) + b_out
    o_ref[...] = jax.nn.sigmoid(z)


def _round_up(n, m):
    return ((n + m - 1) // m) * m


def _choose_tile(B, tb=None):
    """Pick the batch (lane) tile and the padded batch size."""
    if tb is None:
        if B <= 512:
            # Single grid step: block last dim == full padded array dim, so any
            # width is layout-legal. Megacore doesn't matter at this size.
            tb = _round_up(B, 8)
        else:
            # Lane-aligned tiles (multiple of 128), capped at 1024 lanes, and
            # capped at ~B/2 so the "parallel" grid has >= 2 steps (v7x: 2 TCs).
            tb = min(1024, _round_up((B + 1) // 2, 128))
    b_pad = _round_up(B, tb)
    if b_pad > tb:
        # Multi-tile grids need a lane-aligned tile for the (8,128) rule.
        assert tb % 128 == 0, "multi-tile grids require tb to be a multiple of 128"
    return tb, b_pad


def mlp_forward(x, params, *, tb=None):
    """x: [B, layers[0]] f32; params: flat list [W1, b1, ..., w_out, b_out].

    Returns sigmoid(MLP(x)) with shape [B, 1].
    """
    B, D0 = x.shape
    tb, b_pad = _choose_tile(B, tb)

    # Transpose so the batch sits on the lane axis; pad to a tile multiple.
    # (Wrapper-side transpose/pad is layout plumbing; padded columns are junk
    # and sliced away below.)
    x_t = x.T
    if b_pad != B:
        x_t = jnp.pad(x_t, ((0, 0), (0, b_pad - B)))

    grid = (b_pad // tb,)

    # x is tiled over the batch (lane) axis; weights/biases have constant block
    # indices so they stay resident in VMEM across grid steps.
    in_specs = [pl.BlockSpec((D0, tb), lambda i: (0, i))]
    for p in params:
        in_specs.append(pl.BlockSpec(p.shape, lambda i: (0, 0)))

    # Lane-dense output: each step writes a contiguous (1, tb) slab.
    out_spec = pl.BlockSpec((1, tb), lambda i: (0, i))

    out = pl.pallas_call(
        _mlp_kernel,
        out_shape=jax.ShapeDtypeStruct((1, b_pad), jnp.float32),
        grid_spec=pltpu.PrefetchScalarGridSpec(
            num_scalar_prefetch=0,
            grid=grid,
            in_specs=in_specs,
            out_specs=out_spec,
        ),
        compiler_params=pltpu.CompilerParams(
            dimension_semantics=("parallel",),
        ),
    )(x_t, *params)

    return out[0, :B].reshape(B, 1)


def init_params(key, layers):
    """nn.Linear-style init. Hidden W: [out, in] (PyTorch layout), b: [out, 1].
    Final layer weight stored as a [hidden, 1] column, bias as [1, 1]."""
    params = []
    dims = list(layers)
    for i in range(1, len(dims)):
        key, kw, kb = jax.random.split(key, 3)
        fan_in, fan_out = dims[i - 1], dims[i]
        bound = float(fan_in) ** -0.5
        w = jax.random.uniform(kw, (fan_out, fan_in), jnp.float32, -bound, bound)
        b = jax.random.uniform(kb, (fan_out, 1), jnp.float32, -bound, bound)
        params += [w, b]
    key, kw, kb = jax.random.split(key, 3)
    fan_in = dims[-1]
    bound = float(fan_in) ** -0.5
    w_out = jax.random.uniform(kw, (fan_in, 1), jnp.float32, -bound, bound)
    b_out = jax.random.uniform(kb, (1, 1), jnp.float32, -bound, bound)
    params += [w_out, b_out]
    return params


def mlp_reference(x, params):
    """Pure-JAX reference (standard [batch, feature] orientation)."""
    h = x
    for j in range(0, len(params) - 2, 2):
        w, b = params[j], params[j + 1]
        h = jnp.maximum(h @ w.T + b.reshape(1, -1), 0.0)
    w_out, b_out = params[-2], params[-1]
    return jax.nn.sigmoid(h @ w_out + b_out.reshape(1, -1))


if __name__ == "__main__":
    # Small, module-consistent config.
    n_user, n_item = 50, 40
    layers = [32, 16, 8]          # layers[0] must be even (split across embeddings)
    B = 16                        # batch of (user, item) pairs

    key = jax.random.PRNGKey(0)
    k_eu, k_ei, k_u, k_i, k_p, k_u2, k_i2 = jax.random.split(key, 7)

    emb_dim = layers[0] // 2
    # nn.init.normal_ on the embedding tables
    emb_user = jax.random.normal(k_eu, (n_user, emb_dim), jnp.float32)
    emb_item = jax.random.normal(k_ei, (n_item, emb_dim), jnp.float32)
    params = init_params(k_p, layers)

    def gather_concat(users, items):
        # Embedding gather + concat glue kept in XLA.
        # TODO(synk): could be fused into the kernel with
        # PrefetchScalarGridSpec(num_scalar_prefetch=2) + pl.Element row-gather
        # BlockSpecs on the two embedding tables.
        user_e = jnp.take(emb_user, users, axis=0)
        item_e = jnp.take(emb_item, items, axis=0)
        return jnp.concatenate([user_e, item_e], axis=1)  # [B, layers[0]]

    # --- small batch: single tile, grid=(1,) ---
    users = jax.random.randint(k_u, (B,), 0, n_user, dtype=jnp.int32)
    items = jax.random.randint(k_i, (B,), 0, n_item, dtype=jnp.int32)
    x_small = gather_concat(users, items)
    preds_small = jax.block_until_ready(mlp_forward(x_small, params))
    ref_small = mlp_reference(x_small, params)
    assert preds_small.shape == (B, 1)
    assert jnp.allclose(preds_small, ref_small, atol=1e-4), "small-batch mismatch"

    # --- larger, non-tile-multiple batch: exercises padding, 1024-lane tiles
    #     and the >=2-step parallel grid (v7x megacore path). ---
    B2 = 2000
    users2 = jax.random.randint(k_u2, (B2,), 0, n_user, dtype=jnp.int32)
    items2 = jax.random.randint(k_i2, (B2,), 0, n_item, dtype=jnp.int32)
    x_big = gather_concat(users2, items2)
    preds_big = jax.block_until_ready(mlp_forward(x_big, params))
    ref_big = mlp_reference(x_big, params)
    assert preds_big.shape == (B2, 1)
    assert jnp.allclose(preds_big, ref_big, atol=1e-4), "large-batch mismatch"

    print("KERNEL_OK")
</pallas_src>

<mosaic_0001>
module attributes {stable_mosaic.version = 11 : i64} {
  func.func @_mlp_kernel(%arg0: i32, %arg1: memref<32x16xf32, #tpu.memory_space<vmem>>, %arg2: memref<16x32xf32, #tpu.memory_space<vmem>>, %arg3: memref<16x1xf32, #tpu.memory_space<vmem>>, %arg4: memref<8x16xf32, #tpu.memory_space<vmem>>, %arg5: memref<8x1xf32, #tpu.memory_space<vmem>>, %arg6: memref<8x1xf32, #tpu.memory_space<vmem>>, %arg7: memref<1x1xf32, #tpu.memory_space<vmem>>, %arg8: memref<1x16xf32, #tpu.memory_space<vmem>>) attributes {dimension_semantics = [#tpu.dimension_semantics<parallel>], iteration_bounds = array<i64: 1>, scalar_prefetch = 0 : i64, scratch_operands = 0 : i64, tpu.core_type = #tpu.core_type<tc>, window_params = [{transform_indices = @transform_0, window_bounds = array<i64: 32, 16>}, {pipeline_mode = #tpu.pipeline_mode<synchronous>, transform_indices = @transform_1, window_bounds = array<i64: 16, 32>}, {pipeline_mode = #tpu.pipeline_mode<synchronous>, transform_indices = @transform_2, window_bounds = array<i64: 16, 1>}, {pipeline_mode = #tpu.pipeline_mode<synchronous>, transform_indices = @transform_3, window_bounds = array<i64: 8, 16>}, {pipeline_mode = #tpu.pipeline_mode<synchronous>, transform_indices = @transform_4, window_bounds = array<i64: 8, 1>}, {pipeline_mode = #tpu.pipeline_mode<synchronous>, transform_indices = @transform_5, window_bounds = array<i64: 8, 1>}, {pipeline_mode = #tpu.pipeline_mode<synchronous>, transform_indices = @transform_6, window_bounds = array<i64: 1, 1>}, {transform_indices = @transform_7, window_bounds = array<i64: 1, 16>}]} {
    %c0 = arith.constant 0 : index
    %c0_0 = arith.constant 0 : index
    %0 = vector.load %arg1[%c0, %c0_0] : memref<32x16xf32, #tpu.memory_space<vmem>>, vector<32x16xf32>
    %c0_1 = arith.constant 0 : index
    %c0_2 = arith.constant 0 : index
    %1 = vector.load %arg2[%c0_1, %c0_2] : memref<16x32xf32, #tpu.memory_space<vmem>>, vector<16x32xf32>
    %c0_3 = arith.constant 0 : index
    %c0_4 = arith.constant 0 : index
    %2 = vector.load %arg3[%c0_3, %c0_4] : memref<16x1xf32, #tpu.memory_space<vmem>>, vector<16x1xf32>
    %cst = arith.constant dense<0.000000e+00> : vector<16x16xf32>
    %3 = tpu.matmul %1, %0, %cst {dimension_numbers = #tpu.dot_dimension_numbers<[1], [0], [0], [1], [0, 0, 1, 1], [], []>} : vector<16x32xf32>, vector<32x16xf32>, vector<16x16xf32> -> vector<16x16xf32>
    %4 = vector.broadcast %2 : vector<16x1xf32> to vector<16x16xf32>
    %5 = arith.addf %3, %4 : vector<16x16xf32>
    %cst_5 = arith.constant 0.000000e+00 : f32
    %6 = vector.broadcast %cst_5 : f32 to vector<16x16xf32>
    %7 = arith.maximumf %5, %6 : vector<16x16xf32>
    %c0_6 = arith.constant 0 : index
    %c0_7 = arith.constant 0 : index
    %8 = vector.load %arg4[%c0_6, %c0_7] : memref<8x16xf32, #tpu.memory_space<vmem>>, vector<8x16xf32>
    %c0_8 = arith.constant 0 : index
    %c0_9 = arith.constant 0 : index
    %9 = vector.load %arg5[%c0_8, %c0_9] : memref<8x1xf32, #tpu.memory_space<vmem>>, vector<8x1xf32>
    %cst_10 = arith.constant dense<0.000000e+00> : vector<8x16xf32>
    %10 = tpu.matmul %8, %7, %cst_10 {dimension_numbers = #tpu.dot_dimension_numbers<[1], [0], [0], [1], [0, 0, 1, 1], [], []>} : vector<8x16xf32>, vector<16x16xf32>, vector<8x16xf32> -> vector<8x16xf32>
    %11 = vector.broadcast %9 : vector<8x1xf32> to vector<8x16xf32>
    %12 = arith.addf %10, %11 : vector<8x16xf32>
    %cst_11 = arith.constant 0.000000e+00 : f32
    %13 = vector.broadcast %cst_11 : f32 to vector<8x16xf32>
    %14 = arith.maximumf %12, %13 : vector<8x16xf32>
    %c0_12 = arith.constant 0 : index
    %c0_13 = arith.constant 0 : index
    %15 = vector.load %arg6[%c0_12, %c0_13] : memref<8x1xf32, #tpu.memory_space<vmem>>, vector<8x1xf32>
    %c0_14 = arith.constant 0 : index
    %c0_15 = arith.constant 0 : index
    %16 = vector.load %arg7[%c0_14, %c0_15] : memref<1x1xf32, #tpu.memory_space<vmem>>, vector<1x1xf32>
    %17 = vector.broadcast %15 : vector<8x1xf32> to vector<8x16xf32>
    %18 = arith.mulf %14, %17 : vector<8x16xf32>
    %cst_16 = arith.constant dense<0.000000e+00> : vector<16xf32>
    %19 = vector.multi_reduction <add>, %18, %cst_16 [0] : vector<8x16xf32> to vector<16xf32>
    %20 = vector.shape_cast %19 : vector<16xf32> to vector<1x16xf32>
    %21 = vector.broadcast %16 : vector<1x1xf32> to vector<1x16xf32>
    %22 = arith.addf %20, %21 : vector<1x16xf32>
    %23 = arith.negf %22 : vector<1x16xf32>
    %24 = math.exp %23 : vector<1x16xf32>
    %cst_17 = arith.constant 1.000000e+00 : f32
    %25 = vector.broadcast %cst_17 : f32 to vector<1x16xf32>
    %26 = arith.addf %25, %24 : vector<1x16xf32>
    %27 = arith.divf %25, %26 : vector<1x16xf32>
    %c0_18 = arith.constant 0 : index
    %c0_19 = arith.constant 0 : index
    %28 = vector.load %arg8[%c0_18, %c0_19] : memref<1x16xf32, #tpu.memory_space<vmem>>, vector<1x16xf32>
    tpu.vector_store %arg8[%c0_18, %c0_19], %27 {strides = array<i32>} : memref<1x16xf32, #tpu.memory_space<vmem>>, vector<1x16xf32>,
    return
  }
  func.func @transform_0(%arg0: i32) -> (i32, i32) {
    %c0_i32 = arith.constant 0 : i32
    %c0_i32_0 = arith.constant 0 : i32
    return %c0_i32, %arg0 : i32, i32
  }
  func.func @transform_1(%arg0: i32) -> (i32, i32) {
    %c0_i32 = arith.constant 0 : i32
    %c0_i32_0 = arith.constant 0 : i32
    %c0_i32_1 = arith.constant 0 : i32
    return %c0_i32, %c0_i32_0 : i32, i32
  }
  func.func @transform_2(%arg0: i32) -> (i32, i32) {
    %c0_i32 = arith.constant 0 : i32
    %c0_i32_0 = arith.constant 0 : i32
    %c0_i32_1 = arith.constant 0 : i32
    return %c0_i32, %c0_i32_0 : i32, i32
  }
  func.func @transform_3(%arg0: i32) -> (i32, i32) {
    %c0_i32 = arith.constant 0 : i32
    %c0_i32_0 = arith.constant 0 : i32
    %c0_i32_1 = arith.constant 0 : i32
    return %c0_i32, %c0_i32_0 : i32, i32
  }
  func.func @transform_4(%arg0: i32) -> (i32, i32) {
    %c0_i32 = arith.constant 0 : i32
    %c0_i32_0 = arith.constant 0 : i32
    %c0_i32_1 = arith.constant 0 : i32
    return %c0_i32, %c0_i32_0 : i32, i32
  }
  func.func @transform_5(%arg0: i32) -> (i32, i32) {
    %c0_i32 = arith.constant 0 : i32
    %c0_i32_0 = arith.constant 0 : i32
    %c0_i32_1 = arith.constant 0 : i32
    return %c0_i32, %c0_i32_0 : i32, i32
  }
  func.func @transform_6(%arg0: i32) -> (i32, i32) {
    %c0_i32 = arith.constant 0 : i32
    %c0_i32_0 = arith.constant 0 : i32
    %c0_i32_1 = arith.constant 0 : i32
    return %c0_i32, %c0_i32_0 : i32, i32
  }
  func.func @transform_7(%arg0: i32) -> (i32, i32) {
    %c0_i32 = arith.constant 0 : i32
    %c0_i32_0 = arith.constant 0 : i32
    return %c0_i32, %arg0 : i32, i32
  }
}

</mosaic_0001>

<bundles_post_ra>
// kernel: tpu_custom_call.1
= control target key start
LH: loop header
LB: loop body
LE: loop exit
PB: predicated region body
PF: predicated region fallthrough
CT: control target
= control target key end

     0   :  { %s432_s0 = inlined_call_operand.vmem [shape: f32[32,16], index: 0, kind: input, shape index: {}]   ;;  %s433_s1 = inlined_call_operand.vmem [shape: f32[16,32], index: 1, kind: input, shape index: {}]   ;;  %s434_s2 = inlined_call_operand.vmem [shape: f32[16,1], index: 2, kind: input, shape index: {}]   ;;  %s435_s3 = inlined_call_operand.vmem [shape: f32[8,16], index: 3, kind: input, shape index: {}]   ;;  %s436_s4 = inlined_call_operand.vmem [shape: f32[8,1], index: 4, kind: input, shape index: {}]   ;;  %s437_s5 = inlined_call_operand.vmem [shape: f32[8,1], index: 5, kind: input, shape index: {}]   ;;  %s438_s6 = inlined_call_operand.<no memory space> [shape: f32[1,1], index: 6, kind: input, shape index: {}]   ;;  %s439_s7 = inlined_call_operand.hbm [shape: f32[1,16], index: 7, kind: output, shape index: {}]  }
   0x1   :  { %v12_v0 = vstv %s438_s6 }
   0x2   :  { %13 = vst [vmem:[#allocation2] sm:$0x1] %v12_v0 }
   0x3   :  { %v29_v1 = vld [vmem:[%s432_s0] sm:$0xff]  ;;  %v30_v2 = vld [vmem:[%s432_s0 + $0x8] sm:$0xff]  ;;  %v31_v3 = vld [vmem:[%s432_s0 + $0x10] sm:$0xff]  ;;  %vm47_vm0 = vcmask 261120   ;;  %v337_v7 = vmov 0  }
   0x4   :  { %v291_v4 = vpack.c.bf16 %v30_v2, %v29_v1  ;;  %v32_v5 = vld [vmem:[%s432_s0 + $0x18] sm:$0xff]  ;;  %v33_v6 = vld [vmem:[%s433_s1] sm:$0xff]  ;;  %307 = vset.pattern.permute.xlu0 %v337_v7  ;;  %308 = vset.pattern.permute.xlu1 %v337_v7 }
   0x5   :  { %v295_v8 = vpack.c.bf16 %v32_v5, %v31_v3  ;;  %281 = vmatprep.mubr.msk.f32.mxu0 %vm47_vm0, %v33_v6  ;;  %v35_v9 = vld [vmem:[%s434_s2] sm:$0xff] }
   0x6   :  { %292 = vmatprep.subr.bf16.mxu0 %v291_v4  ;;  %39 = vperm.xlu0 %307, %v35_v9  }
   0x7   :  { %14 = vsyncpa [#allocation4], 0  ;;  %294 = vmatpush3.bf16.msra.mxu0 %v291_v4  ;;  %v36_v10 = vld [vmem:[%s434_s2 + $0x8] sm:$0xff]  ;;  %v338_v13 = vmov 0.0|0.0   ;;  %vm339_vm1 = vmmov 0   ;;  %v340_v14 = vmov 0.0   ;;  %v233_v34 = vlaneseq }
   0x8   :  { %296 = vmatprep.subr.bf16.mxu0 %v295_v8  ;;  %v34_v11 = vld [vmem:[%s433_s1 + $0x8] sm:$0xff]  ;;  %299 = vmatprep.subr.bf16.mxu1 %v338_v13  ;;  %v132_v15 = vld [vmem:[%s436_s4] sm:$0xff]  ;;  %vm138_vm2 = vcmask 130048   ;;  %vm244_vm3 = vcmask 122880  }
   0x9   :  { %v214_v12 = vld [vmem:[#allocation2] sm:$0x1]  ;;  %288 = vmatprep.mubr.msk.f32.mxu1 %vm339_vm1, %v340_v14  ;;  %135 = vperm.xlu1 %308, %v132_v15   ;;  %v234_v37 = vshrl.u32 %v233_v34, 7 }
   0xa   :  { %44 = vperm.xlu0 %307, %v36_v10   ;;  %v213_v16 = vld [vmem:[%s437_s5] sm:$0xff] }
   0xb   :  { %298 = vmatpush3.bf16.msra.mxu0 %v295_v8  ;;  %v131_v26 = vld [vmem:[%s435_s3] sm:$0xff]  ;;  %v235_v40 = vsub.s32 0, %v234_v37  ;;  %s341_s3 = smov [#allocation3]  }
   0xc   :  { %s252_s4 = sshll.u32 %s341_s3, 4  ;;  %s253_s4 = int_to_ptr.vmem [resolvable:$true] %s252_s4 }
   0xd   :  { %217 = vperm.xlu1 %308, %v213_v16   ;;  %s313_s5 = scalar_lea.vmem %s253_s4, 16  ;;  %s317_s21 = scalar_lea.vmem %s253_s4, 32 }
   0xe   :  { %282 = vmatmul.mubr.msk.f32.vlgmr.msra.gmra.mrb[0].mxu0 %vm47_vm0, %v34_v11  ;;  %230 = vperm.xlu0 %307, %v214_v12   ;;  %p314_p0 = scmp.ne.s32.totalorder %s253_s4, %s313_s5  ;;  %p318_p1 = scmp.lt.s32.totalorder %s253_s4, %s253_s4 }
   0xf   :  { %p319_p2 = scmp.lt.s32.totalorder %s317_s21, %s313_s5 }
  0x11   :  { %p320_p3 = por %p319_p2, %p318_p1 }
  0x13   :  { %p321_p4 = pnand %p320_p3, %p314_p0 }
  0x85   :  { %v40_v17 = vpop.permute.xlu0 %39 }
  0x88   :  { %v136_v27 = vpop.permute.xlu1 %135 }
  0x89   :  { %v45_v18 = vpop.permute.xlu0 %44 }
  0x8c   :  { %v218_v32 = vpop.permute.xlu1 %217 }
  0x8d   :  { %v231_v42 = vpop.permute.xlu0 %230 }
  0x8e   :  { %v236_v44 = vrot.slane %v231_v42, %v235_v40 }
  0xe1   :  { %v283_v19 = vpop.f32.mrb[0].mxu0 }
  0xe2   :  { %v126_v20 = vadd.f32 %v283_v19, %v45_v18  ;;  %v120_v21 = vpop.f32.mrb[1].mxu0 }
  0xe3   :  { %v121_v22 = vadd.f32 %v120_v21, %v40_v17 }
  0xe4   :  { %v130_v23 = vmax.f32 %v126_v20, 0.0 }
  0xe5   :  { %v129_v24 = vmax.f32 %v121_v22, 0.0 }
  0xe7   :  { %v300_v25 = vpack.c.bf16 %v130_v23, %v129_v24 }
  0xe9   :  { %301 = vmatpush3.bf16.msra.mxu1 %v300_v25 }
  0xec   :  { %289 = vmatmul.mubr.msk.f32.vlgmr.msra.gmra.mrb[0].mxu1 %vm138_vm2, %v131_v26 }
 0x1bf   :  { %v208_v28 = vpop.f32.mrb[0].mxu1 }
 0x1c0   :  { %v209_v29 = vadd.f32 %v208_v28, %v136_v27  ;;  %v290_v30 = vpop.f32.mrb[1].mxu1 }
 0x1c2   :  { %v212_v31 = vmax.f32 %v209_v29, 0.0 }
 0x1c4   :  { %v220_v33 = vmul.f32 %v218_v32, %v212_v31 }
 0x1c6   :  { %v221_v35 = vsel %vm138_vm2, %v220_v33, 0.0 }
 0x1c7   :  { %v222_v36 = vrot.slane %v221_v35, 4 }
 0x1c9   :  { %v223_v38 = vadd.f32 %v222_v36, %v221_v35 }
 0x1cb   :  { %v224_v39 = vrot.slane %v223_v38, 2 }
 0x1cd   :  { %v225_v41 = vadd.f32 %v224_v39, %v223_v38 }
 0x1cf   :  { %v226_v43 = vrot.slane %v225_v41, 1 }
 0x1d1   :  { %v227_v45 = vadd.f32 %v226_v43, %v225_v41 }
 0x1d3   :  { %v237_v46 = vadd.f32 %v236_v44, %v227_v45 }
 0x1d5   :  { %v263_v47 = vmul.f32 -1.442695, %v237_v46 }
 0x1d7   :  { %309 = vpow2.f32 %v263_v47 }
 0x1e1   :  { %v310_v48 = vpop.eup %309 }
 0x1e2   :  { %v241_v49 = vadd.f32 1.0, %v310_v48 }
 0x1e4   :  { %311 = vrcp.f32 %v241_v49 }
 0x1ee   :  { %v312_v50 = vpop.eup %311 }
 0x1ef   :  { %245 = vst.msk [vmem:[#allocation3] sm:$0x1] %vm244_vm3, %v312_v50 }
 0x1f0   :  { %324 = shalt.err (!%p321_p4)
}
 0x1f1   :  { %s325_s24 = scalar_lea.hbm %s439_s7, 16 }
 0x1f2   :  { %p326_p5 = scmp.ne.s32.totalorder %s439_s7, %s325_s24  ;;  %p329_p6 = scmp.lt.u32.totalorder %s325_s24, %s439_s7 }
 0x1f4   :  { %p331_p7 = pnand %p329_p6, %p326_p5 }
 0x1f6   :  { %334 = shalt.err (!%p331_p7)
}
 0x1f7   :  { %255 = dma.vmem_to_hbm [thread:$0]  %s253_s4, 16, %s439_s7, [#allocation4]  }
 0x1f8   :  { %335 = dma.done.wait [#allocation4], 16  }
 0x1f9   :  { %336 = vsyncadd [#allocation4], 4294967280 }
 0x1fa   :  { %259 = vsyncpa [#allocation4], 1 }

</bundles_post_ra>
